<compile_context>
chip_gen: v7x
topology: tpu7x:2x2x1
jax: 0.10.0
libtpu: 0.0.40
codegen_flags: <defaults>
</compile_context>

<pallas_src>
import functools
import math

import jax
import jax.numpy as jnp
from jax.experimental import pallas as pl
from jax.experimental.pallas import tpu as pltpu

HIDDEN = 256          # matches nn.Linear(num_inputs, 256) / NoisyLinear(256, .)
LANE = 128            # TPU lane width
BF16_SUBLANE = 16     # bf16 sublane packing granularity


def _round_up(x, m):
    return (x + m - 1) // m * m


# ----------------------------------------------------------------------------
# Pallas kernel: fused 3-layer MLP (Linear+ReLU, NoisyLinear+ReLU, NoisyLinear)
# Matmul inputs are bf16 (native MXU dtype); accumulate / bias / ReLU in f32.
# Weights arrive pre-transposed as [in, out]; biases as [1, out].
# ----------------------------------------------------------------------------
def noisy_dqn_kernel(x_ref, w1_ref, b1_ref, w2_ref, b2_ref, w3_ref, b3_ref,
                     out_ref):
    x = x_ref[...]                                               # [TB, K_pad] bf16
    h1 = jnp.dot(x, w1_ref[...], preferred_element_type=jnp.float32)
    h1 = jnp.maximum(h1 + b1_ref[...], 0.0)                      # [TB, 256] f32
    h2 = jnp.dot(h1.astype(jnp.bfloat16), w2_ref[...],
                 preferred_element_type=jnp.float32)
    h2 = jnp.maximum(h2 + b2_ref[...], 0.0)                      # [TB, 256] f32
    q = jnp.dot(h2.astype(jnp.bfloat16), w3_ref[...],
                preferred_element_type=jnp.float32)
    out_ref[...] = q + b3_ref[...]                               # [TB, A_pad] f32


# ----------------------------------------------------------------------------
# Forward wrapper: noisy-weight composition + padding + pallas_call, one jit.
# ----------------------------------------------------------------------------
@functools.partial(jax.jit, static_argnames=("training", "tile_b"))
def noisy_dqn_forward(x, params, training=True, tile_b=256):
    """x: [B, num_inputs] f32.  params: raw mu/sigma/epsilon param tree."""
    B, K = x.shape
    num_actions = params["noisy2"]["weight_mu"].shape[0]

    # ---- compose effective noisy weights (training: mu + sigma * eps) ------
    def compose(layer):
        if training:
            w = layer["weight_mu"] + layer["weight_sigma"] * layer["weight_epsilon"]
            b = layer["bias_mu"] + layer["bias_sigma"] * layer["bias_epsilon"]
        else:
            w, b = layer["weight_mu"], layer["bias_mu"]
        return w, b

    w1, b1 = params["linear"]["weight"], params["linear"]["bias"]
    w2, b2 = compose(params["noisy1"])
    w3, b3 = compose(params["noisy2"])

    # ---- pad to MXU / lane granularity and convert to kernel layout --------
    K_pad = _round_up(max(K, LANE), LANE)
    A_pad = _round_up(max(num_actions, LANE), LANE)
    B_pad = _round_up(max(B, BF16_SUBLANE), BF16_SUBLANE)
    TB = min(tile_b, B_pad)
    B_pad = _round_up(B_pad, TB)

    x_p = jnp.zeros((B_pad, K_pad), jnp.bfloat16).at[:B, :K].set(
        x.astype(jnp.bfloat16))
    w1_p = jnp.zeros((K_pad, HIDDEN), jnp.bfloat16).at[:K, :].set(
        w1.T.astype(jnp.bfloat16))
    w2_p = w2.T.astype(jnp.bfloat16)                              # [256, 256]
    w3_p = jnp.zeros((HIDDEN, A_pad), jnp.bfloat16).at[:, :num_actions].set(
        w3.T.astype(jnp.bfloat16))
    b1_p = b1[None, :].astype(jnp.float32)
    b2_p = b2[None, :].astype(jnp.float32)
    b3_p = jnp.zeros((1, A_pad), jnp.float32).at[:, :num_actions].set(
        b3[None, :].astype(jnp.float32))

    grid = (B_pad // TB,)
    flops = 2 * B_pad * (K_pad * HIDDEN + HIDDEN * HIDDEN + HIDDEN * A_pad)
    bytes_accessed = (x_p.size * 2 + w1_p.size * 2 + w2_p.size * 2
                      + w3_p.size * 2
                      + (b1_p.size + b2_p.size + b3_p.size) * 4
                      + B_pad * A_pad * 4)

    q_pad = pl.pallas_call(
        noisy_dqn_kernel,
        out_shape=jax.ShapeDtypeStruct((B_pad, A_pad), jnp.float32),
        grid_spec=pltpu.PrefetchScalarGridSpec(
            num_scalar_prefetch=0,
            grid=grid,
            in_specs=[
                pl.BlockSpec((TB, K_pad), lambda i: (i, 0)),       # x tile
                pl.BlockSpec((K_pad, HIDDEN), lambda i: (0, 0)),   # W1 resident
                pl.BlockSpec((1, HIDDEN), lambda i: (0, 0)),       # b1
                pl.BlockSpec((HIDDEN, HIDDEN), lambda i: (0, 0)),  # W2 resident
                pl.BlockSpec((1, HIDDEN), lambda i: (0, 0)),       # b2
                pl.BlockSpec((HIDDEN, A_pad), lambda i: (0, 0)),   # W3 resident
                pl.BlockSpec((1, A_pad), lambda i: (0, 0)),        # b3
            ],
            out_specs=pl.BlockSpec((TB, A_pad), lambda i: (i, 0)),
        ),
        compiler_params=pltpu.CompilerParams(
            dimension_semantics=("parallel",)),
        cost_estimate=pl.CostEstimate(
            flops=flops, transcendentals=0, bytes_accessed=bytes_accessed),
    )(x_p, w1_p, b1_p, w2_p, b2_p, w3_p, b3_p)

    return q_pad[:B, :num_actions]


# ----------------------------------------------------------------------------
# Deterministic parameter construction (mirrors the PyTorch __init__ semantics)
# ----------------------------------------------------------------------------
def _scale_noise(key, size):
    x = jax.random.normal(key, (size,), dtype=jnp.float32)
    return jnp.sign(x) * jnp.sqrt(jnp.abs(x))


def _noisy_linear_params(key, in_f, out_f, std_init=0.4):
    k_mu_w, k_mu_b, k_eps_in, k_eps_out, k_eps_b = jax.random.split(key, 5)
    mu_range = 1.0 / math.sqrt(in_f)
    eps_in = _scale_noise(k_eps_in, in_f)
    eps_out = _scale_noise(k_eps_out, out_f)
    return {
        "weight_mu": jax.random.uniform(k_mu_w, (out_f, in_f), jnp.float32,
                                        -mu_range, mu_range),
        "weight_sigma": jnp.full((out_f, in_f), std_init / math.sqrt(in_f),
                                 jnp.float32),
        "weight_epsilon": jnp.outer(eps_out, eps_in),
        "bias_mu": jax.random.uniform(k_mu_b, (out_f,), jnp.float32,
                                      -mu_range, mu_range),
        "bias_sigma": jnp.full((out_f,), std_init / math.sqrt(out_f),
                               jnp.float32),
        "bias_epsilon": _scale_noise(k_eps_b, out_f),
    }


def _linear_params(key, in_f, out_f):
    k_w, k_b = jax.random.split(key)
    bound = 1.0 / math.sqrt(in_f)
    return {
        "weight": jax.random.uniform(k_w, (out_f, in_f), jnp.float32,
                                     -bound, bound),
        "bias": jax.random.uniform(k_b, (out_f,), jnp.float32, -bound, bound),
    }


def make_noisy_dqn_params(key, num_inputs, num_actions, hidden=HIDDEN):
    k1, k2, k3 = jax.random.split(key, 3)
    return {
        "linear": _linear_params(k1, num_inputs, hidden),
        "noisy1": _noisy_linear_params(k2, hidden, hidden),
        "noisy2": _noisy_linear_params(k3, hidden, num_actions),
    }


# ----------------------------------------------------------------------------
# Pure-JAX f32 reference for a sanity check
# ----------------------------------------------------------------------------
def reference_forward(x, params, training=True):
    def compose(layer):
        if training:
            w = layer["weight_mu"] + layer["weight_sigma"] * layer["weight_epsilon"]
            b = layer["bias_mu"] + layer["bias_sigma"] * layer["bias_epsilon"]
        else:
            w, b = layer["weight_mu"], layer["bias_mu"]
        return w, b

    h1 = jnp.maximum(x @ params["linear"]["weight"].T + params["linear"]["bias"], 0.0)
    w2, b2 = compose(params["noisy1"])
    h2 = jnp.maximum(h1 @ w2.T + b2, 0.0)
    w3, b3 = compose(params["noisy2"])
    return h2 @ w3.T + b3


if __name__ == "__main__":
    num_inputs, num_actions, batch = 32, 8, 2
    key = jax.random.PRNGKey(0)
    k_params, k_x = jax.random.split(key)

    params = make_noisy_dqn_params(k_params, num_inputs, num_actions)
    x = jax.random.normal(k_x, (batch, num_inputs), dtype=jnp.float32)

    q = noisy_dqn_forward(x, params)
    q = jax.block_until_ready(q)

    q_ref = reference_forward(x, params)
    assert q.shape == (batch, num_actions)
    # bf16 matmul inputs (f32 accumulation) -> slightly looser tolerance vs f32 ref
    assert jnp.allclose(q, q_ref, atol=5e-2, rtol=5e-2), \
        float(jnp.max(jnp.abs(q - q_ref)))

    print("KERNEL_OK")
</pallas_src>

<mosaic_0001>
module attributes {stable_mosaic.version = 11 : i64} {
  func.func @noisy_dqn_kernel(%arg0: i32, %arg1: memref<16x128xbf16, #tpu.memory_space<vmem>>, %arg2: memref<128x256xbf16, #tpu.memory_space<vmem>>, %arg3: memref<1x256xf32, #tpu.memory_space<vmem>>, %arg4: memref<256x256xbf16, #tpu.memory_space<vmem>>, %arg5: memref<1x256xf32, #tpu.memory_space<vmem>>, %arg6: memref<256x128xbf16, #tpu.memory_space<vmem>>, %arg7: memref<1x128xf32, #tpu.memory_space<vmem>>, %arg8: memref<16x128xf32, #tpu.memory_space<vmem>>) attributes {dimension_semantics = [#tpu.dimension_semantics<parallel>], iteration_bounds = array<i64: 1>, scalar_prefetch = 0 : i64, scratch_operands = 0 : i64, tpu.core_type = #tpu.core_type<tc>, window_params = [{transform_indices = @transform_0, window_bounds = array<i64: 16, 128>}, {pipeline_mode = #tpu.pipeline_mode<synchronous>, transform_indices = @transform_1, window_bounds = array<i64: 128, 256>}, {pipeline_mode = #tpu.pipeline_mode<synchronous>, transform_indices = @transform_2, window_bounds = array<i64: 1, 256>}, {pipeline_mode = #tpu.pipeline_mode<synchronous>, transform_indices = @transform_3, window_bounds = array<i64: 256, 256>}, {pipeline_mode = #tpu.pipeline_mode<synchronous>, transform_indices = @transform_4, window_bounds = array<i64: 1, 256>}, {pipeline_mode = #tpu.pipeline_mode<synchronous>, transform_indices = @transform_5, window_bounds = array<i64: 256, 128>}, {pipeline_mode = #tpu.pipeline_mode<synchronous>, transform_indices = @transform_6, window_bounds = array<i64: 1, 128>}, {transform_indices = @transform_7, window_bounds = array<i64: 16, 128>}]} {
    %c0 = arith.constant 0 : index
    %c0_0 = arith.constant 0 : index
    %0 = vector.load %arg1[%c0, %c0_0] : memref<16x128xbf16, #tpu.memory_space<vmem>>, vector<16x128xbf16>
    %c0_1 = arith.constant 0 : index
    %c0_2 = arith.constant 0 : index
    %1 = vector.load %arg2[%c0_1, %c0_2] : memref<128x256xbf16, #tpu.memory_space<vmem>>, vector<128x256xbf16>
    %cst = arith.constant dense<0.000000e+00> : vector<16x256xf32>
    %2 = tpu.matmul %0, %1, %cst {dimension_numbers = #tpu.dot_dimension_numbers<[1], [0], [0], [1], [0, 0, 1, 1], [], []>} : vector<16x128xbf16>, vector<128x256xbf16>, vector<16x256xf32> -> vector<16x256xf32>
    %c0_3 = arith.constant 0 : index
    %c0_4 = arith.constant 0 : index
    %3 = vector.load %arg3[%c0_3, %c0_4] : memref<1x256xf32, #tpu.memory_space<vmem>>, vector<1x256xf32>
    %4 = vector.broadcast %3 : vector<1x256xf32> to vector<16x256xf32>
    %5 = arith.addf %2, %4 : vector<16x256xf32>
    %cst_5 = arith.constant 0.000000e+00 : f32
    %6 = vector.broadcast %cst_5 : f32 to vector<16x256xf32>
    %7 = arith.maximumf %5, %6 : vector<16x256xf32>
    %8 = arith.truncf %7 : vector<16x256xf32> to vector<16x256xbf16>
    %c0_6 = arith.constant 0 : index
    %c0_7 = arith.constant 0 : index
    %9 = vector.load %arg4[%c0_6, %c0_7] : memref<256x256xbf16, #tpu.memory_space<vmem>>, vector<256x256xbf16>
    %cst_8 = arith.constant dense<0.000000e+00> : vector<16x256xf32>
    %10 = tpu.matmul %8, %9, %cst_8 {dimension_numbers = #tpu.dot_dimension_numbers<[1], [0], [0], [1], [0, 0, 1, 1], [], []>} : vector<16x256xbf16>, vector<256x256xbf16>, vector<16x256xf32> -> vector<16x256xf32>
    %c0_9 = arith.constant 0 : index
    %c0_10 = arith.constant 0 : index
    %11 = vector.load %arg5[%c0_9, %c0_10] : memref<1x256xf32, #tpu.memory_space<vmem>>, vector<1x256xf32>
    %12 = vector.broadcast %11 : vector<1x256xf32> to vector<16x256xf32>
    %13 = arith.addf %10, %12 : vector<16x256xf32>
    %cst_11 = arith.constant 0.000000e+00 : f32
    %14 = vector.broadcast %cst_11 : f32 to vector<16x256xf32>
    %15 = arith.maximumf %13, %14 : vector<16x256xf32>
    %16 = arith.truncf %15 : vector<16x256xf32> to vector<16x256xbf16>
    %c0_12 = arith.constant 0 : index
    %c0_13 = arith.constant 0 : index
    %17 = vector.load %arg6[%c0_12, %c0_13] : memref<256x128xbf16, #tpu.memory_space<vmem>>, vector<256x128xbf16>
    %cst_14 = arith.constant dense<0.000000e+00> : vector<16x128xf32>
    %18 = tpu.matmul %16, %17, %cst_14 {dimension_numbers = #tpu.dot_dimension_numbers<[1], [0], [0], [1], [0, 0, 1, 1], [], []>} : vector<16x256xbf16>, vector<256x128xbf16>, vector<16x128xf32> -> vector<16x128xf32>
    %c0_15 = arith.constant 0 : index
    %c0_16 = arith.constant 0 : index
    %19 = vector.load %arg7[%c0_15, %c0_16] : memref<1x128xf32, #tpu.memory_space<vmem>>, vector<1x128xf32>
    %20 = vector.broadcast %19 : vector<1x128xf32> to vector<16x128xf32>
    %21 = arith.addf %18, %20 : vector<16x128xf32>
    %c0_17 = arith.constant 0 : index
    %c0_18 = arith.constant 0 : index
    %22 = vector.load %arg8[%c0_17, %c0_18] : memref<16x128xf32, #tpu.memory_space<vmem>>, vector<16x128xf32>
    tpu.vector_store %arg8[%c0_17, %c0_18], %21 {strides = array<i32>} : memref<16x128xf32, #tpu.memory_space<vmem>>, vector<16x128xf32>,
    return
  }
  func.func @transform_0(%arg0: i32) -> (i32, i32) {
    %c0_i32 = arith.constant 0 : i32
    %c0_i32_0 = arith.constant 0 : i32
    return %arg0, %c0_i32 : i32, i32
  }
  func.func @transform_1(%arg0: i32) -> (i32, i32) {
    %c0_i32 = arith.constant 0 : i32
    %c0_i32_0 = arith.constant 0 : i32
    %c0_i32_1 = arith.constant 0 : i32
    return %c0_i32, %c0_i32_0 : i32, i32
  }
  func.func @transform_2(%arg0: i32) -> (i32, i32) {
    %c0_i32 = arith.constant 0 : i32
    %c0_i32_0 = arith.constant 0 : i32
    %c0_i32_1 = arith.constant 0 : i32
    return %c0_i32, %c0_i32_0 : i32, i32
  }
  func.func @transform_3(%arg0: i32) -> (i32, i32) {
    %c0_i32 = arith.constant 0 : i32
    %c0_i32_0 = arith.constant 0 : i32
    %c0_i32_1 = arith.constant 0 : i32
    return %c0_i32, %c0_i32_0 : i32, i32
  }
  func.func @transform_4(%arg0: i32) -> (i32, i32) {
    %c0_i32 = arith.constant 0 : i32
    %c0_i32_0 = arith.constant 0 : i32
    %c0_i32_1 = arith.constant 0 : i32
    return %c0_i32, %c0_i32_0 : i32, i32
  }
  func.func @transform_5(%arg0: i32) -> (i32, i32) {
    %c0_i32 = arith.constant 0 : i32
    %c0_i32_0 = arith.constant 0 : i32
    %c0_i32_1 = arith.constant 0 : i32
    return %c0_i32, %c0_i32_0 : i32, i32
  }
  func.func @transform_6(%arg0: i32) -> (i32, i32) {
    %c0_i32 = arith.constant 0 : i32
    %c0_i32_0 = arith.constant 0 : i32
    %c0_i32_1 = arith.constant 0 : i32
    return %c0_i32, %c0_i32_0 : i32, i32
  }
  func.func @transform_7(%arg0: i32) -> (i32, i32) {
    %c0_i32 = arith.constant 0 : i32
    %c0_i32_0 = arith.constant 0 : i32
    return %arg0, %c0_i32 : i32, i32
  }
}

</mosaic_0001>

<bundles_post_ra>
// kernel: mul.6
= control target key start
LH: loop header
LB: loop body
LE: loop exit
PB: predicated region body
PF: predicated region fallthrough
CT: control target
= control target key end

     0   :  { %s56_s0 = inlined_call_operand.vmem [shape: f32[8,256], index: 0, kind: input, shape index: {}]   ;;  %s57_s1 = inlined_call_operand.vmem [shape: f32[8,256], index: 1, kind: input, shape index: {}]   ;;  %s58_s2 = inlined_call_operand.vmem [shape: f32[8,256], index: 2, kind: output, shape index: {}]  }
   0x1   :  { %v3_v0 = vld [vmem:[%s56_s0] sm:$0xff]  ;;  %v20_v2 = vld [vmem:[%s56_s0 + $0x8] sm:$0xff] }
   0x2   :  { %v4_v1 = vld [vmem:[%s57_s1] sm:$0xff]  ;;  %v21_v4 = vld [vmem:[%s57_s1 + $0x8] sm:$0xff] }
   0x3   :  { %v7_v3 = vmul.f32 %v4_v1, %v3_v0  ;;  %v16_v5 = vmul.f32 %v21_v4, %v20_v2 }
   0x5   :  { %9 = vst [vmem:[%s58_s2] sm:$0xff] %v7_v3  ;;  %22 = vst [vmem:[%s58_s2 + $0x8] sm:$0xff] %v16_v5 }

// kernel: noisy_dqn_forward.1
= control target key start
LH: loop header
LB: loop body
LE: loop exit
PB: predicated region body
PF: predicated region fallthrough
CT: control target
= control target key end

     0   :  { %v805_v1 = vmov 0   ;;  %v47_v61 = vlaneseq  ;;  %s1056_s1 = inlined_call_operand.vmem [shape: bf16[128,256], index: 1, kind: input, shape index: {}]   ;;  %s1057_s0 = inlined_call_operand.vmem [shape: bf16[16,128], index: 0, kind: input, shape index: {}]   ;;  %s1058_s3 = inlined_call_operand.vmem [shape: bf16[256,256], index: 3, kind: input, shape index: {}]   ;;  %s1059_s5 = inlined_call_operand.vmem [shape: bf16[256,128], index: 5, kind: input, shape index: {}]   ;;  %s1060_s2 = inlined_call_operand.vmem [shape: f32[1,256], index: 2, kind: input, shape index: {}]   ;;  %s1061_s4 = inlined_call_operand.vmem [shape: f32[1,256], index: 4, kind: input, shape index: {}]   ;;  %s1062_s6 = inlined_call_operand.vmem [shape: f32[1,128], index: 6, kind: input, shape index: {}]   ;;  %s1063_s7 = inlined_call_operand.vmem [shape: f32[16,128], index: 7, kind: output, shape index: {}]  }
   0x1   :  { %v716_v0 = vld [vmem:[%s1056_s1 + $0x4] ss:$8 sps:$4 sm:$0xff]   ;;  %175 = vmatprep.mubr.bf16.mxu0 %v805_v1  ;;  %v718_v2 = vld [vmem:[%s1056_s1] ss:$8 sps:$4 sm:$0xff]   ;;  %v719_v3 = vld [vmem:[%s1056_s1 + $0x14] ss:$8 sps:$4 sm:$0xff]  }
   0x2   :  { %143 = vmatprep.subr.bf16.mxu0 %v716_v0  ;;  %v721_v4 = vld [vmem:[%s1056_s1 + $0x10] ss:$8 sps:$4 sm:$0xff]   ;;  %v722_v5 = vld [vmem:[%s1056_s1 + $0x24] ss:$8 sps:$4 sm:$0xff]   ;;  %v724_v6 = vld [vmem:[%s1056_s1 + $0x20] ss:$8 sps:$4 sm:$0xff]  }
   0x3   :  { %144 = vmatpush1.bf16.msra.mxu0 %v718_v2  ;;  %v725_v7 = vld [vmem:[%s1056_s1 + $0x34] ss:$8 sps:$4 sm:$0xff]   ;;  %v727_v8 = vld [vmem:[%s1056_s1 + $0x30] ss:$8 sps:$4 sm:$0xff]   ;;  %v728_v9 = vld [vmem:[%s1056_s1 + $0x44] ss:$8 sps:$4 sm:$0xff]  }
   0x4   :  { %145 = vmatprep.subr.bf16.mxu0 %v719_v3  ;;  %v741_v10 = vld [vmem:[%s1058_s3 + $0x4] ss:$8 sps:$4 sm:$0xff]   ;;  %v743_v11 = vld [vmem:[%s1058_s3] ss:$8 sps:$4 sm:$0xff]   ;;  %v744_v12 = vld [vmem:[%s1058_s3 + $0x14] ss:$8 sps:$4 sm:$0xff]  }
   0x5   :  { %396 = vmatprep.subr.bf16.mxu1 %v741_v10  ;;  %v730_v13 = vld [vmem:[%s1056_s1 + $0x40] ss:$8 sps:$4 sm:$0xff]   ;;  %v746_v14 = vld [vmem:[%s1058_s3 + $0x10] ss:$8 sps:$4 sm:$0xff]   ;;  %v731_v15 = vld [vmem:[%s1056_s1 + $0x54] ss:$8 sps:$4 sm:$0xff]  }
   0x6   :  { %397 = vmatpush1.bf16.msra.mxu1 %v743_v11  ;;  %v747_v16 = vld [vmem:[%s1058_s3 + $0x24] ss:$8 sps:$4 sm:$0xff]   ;;  %v733_v17 = vld [vmem:[%s1056_s1 + $0x50] ss:$8 sps:$4 sm:$0xff]   ;;  %v749_v18 = vld [vmem:[%s1058_s3 + $0x20] ss:$8 sps:$4 sm:$0xff]  }
   0x7   :  { %146 = vmatpush1.bf16.msra.mxu0 %v721_v4  ;;  %398 = vmatprep.subr.bf16.mxu1 %v744_v12  ;;  %v734_v19 = vld [vmem:[%s1056_s1 + $0x64] ss:$8 sps:$4 sm:$0xff]   ;;  %v750_v20 = vld [vmem:[%s1058_s3 + $0x34] ss:$8 sps:$4 sm:$0xff]   ;;  %v736_v21 = vld [vmem:[%s1056_s1 + $0x60] ss:$8 sps:$4 sm:$0xff]  }
   0x8   :  { %147 = vmatprep.subr.bf16.mxu0 %v722_v5  ;;  %v752_v22 = vld [vmem:[%s1058_s3 + $0x30] ss:$8 sps:$4 sm:$0xff]   ;;  %v737_v23 = vld [vmem:[%s1056_s1 + $0x74] ss:$8 sps:$4 sm:$0xff]   ;;  %v753_v24 = vld [vmem:[%s1058_s3 + $0x44] ss:$8 sps:$4 sm:$0xff]  }
   0x9   :  { %v739_v25 = vld [vmem:[%s1056_s1 + $0x70] ss:$8 sps:$4 sm:$0xff]   ;;  %v755_v26 = vld [vmem:[%s1058_s3 + $0x40] ss:$8 sps:$4 sm:$0xff]   ;;  %v756_v27 = vld [vmem:[%s1058_s3 + $0x54] ss:$8 sps:$4 sm:$0xff]  }
   0xa   :  { %399 = vmatpush1.bf16.msra.mxu1 %v746_v14  ;;  %v740_v28 = vld [vmem:[%s1057_s0] sm:$0xff]   ;;  %v758_v29 = vld [vmem:[%s1058_s3 + $0x50] ss:$8 sps:$4 sm:$0xff]   ;;  %v762_v32 = vld [vmem:[%s1058_s3 + $0x74] ss:$8 sps:$4 sm:$0xff]   ;;  %v48_v62 = vshrl.u32 %v47_v61, 7 }
   0xb   :  { %148 = vmatpush1.bf16.msra.mxu0 %v724_v6  ;;  %400 = vmatprep.subr.bf16.mxu1 %v747_v16  ;;  %v759_v30 = vld [vmem:[%s1058_s3 + $0x64] ss:$8 sps:$4 sm:$0xff]   ;;  %v761_v31 = vld [vmem:[%s1058_s3 + $0x60] ss:$8 sps:$4 sm:$0xff]   ;;  %v764_v33 = vld [vmem:[%s1058_s3 + $0x70] ss:$8 sps:$4 sm:$0xff]  }
   0xc   :  { %149 = vmatprep.subr.bf16.mxu0 %v725_v7  ;;  %v765_v34 = vld [vmem:[%s1058_s3 + $0x84] ss:$8 sps:$4 sm:$0xff]   ;;  %v767_v35 = vld [vmem:[%s1058_s3 + $0x80] ss:$8 sps:$4 sm:$0xff]   ;;  %v768_v36 = vld [vmem:[%s1058_s3 + $0x94] ss:$8 sps:$4 sm:$0xff]  }
   0xd   :  { %v770_v37 = vld [vmem:[%s1058_s3 + $0x90] ss:$8 sps:$4 sm:$0xff]   ;;  %v771_v38 = vld [vmem:[%s1058_s3 + $0xa4] ss:$8 sps:$4 sm:$0xff]   ;;  %v773_v39 = vld [vmem:[%s1058_s3 + $0xa0] ss:$8 sps:$4 sm:$0xff]  }
   0xe   :  { %401 = vmatpush1.bf16.msra.mxu1 %v749_v18  ;;  %v774_v40 = vld [vmem:[%s1058_s3 + $0xb4] ss:$8 sps:$4 sm:$0xff]   ;;  %v776_v41 = vld [vmem:[%s1058_s3 + $0xb0] ss:$8 sps:$4 sm:$0xff]   ;;  %v777_v42 = vld [vmem:[%s1058_s3 + $0xc4] ss:$8 sps:$4 sm:$0xff]  }
   0xf   :  { %150 = vmatpush1.bf16.msra.mxu0 %v727_v8  ;;  %402 = vmatprep.subr.bf16.mxu1 %v750_v20  ;;  %v779_v43 = vld [vmem:[%s1058_s3 + $0xc0] ss:$8 sps:$4 sm:$0xff]   ;;  %v780_v44 = vld [vmem:[%s1058_s3 + $0xd4] ss:$8 sps:$4 sm:$0xff]   ;;  %v782_v45 = vld [vmem:[%s1058_s3 + $0xd0] ss:$8 sps:$4 sm:$0xff]  }
  0x10   :  { %151 = vmatprep.subr.bf16.mxu0 %v728_v9  ;;  %v783_v46 = vld [vmem:[%s1058_s3 + $0xe4] ss:$8 sps:$4 sm:$0xff]   ;;  %v785_v47 = vld [vmem:[%s1058_s3 + $0xe0] ss:$8 sps:$4 sm:$0xff]   ;;  %v786_v48 = vld [vmem:[%s1058_s3 + $0xf4] ss:$8 sps:$4 sm:$0xff]  }
  0x11   :  { %v788_v49 = vld [vmem:[%s1058_s3 + $0xf0] ss:$8 sps:$4 sm:$0xff]   ;;  %v789_v50 = vld [vmem:[%s1059_s5 + $0x40] sm:$0xff]   ;;  %v791_v52 = vld [vmem:[%s1059_s5 + $0x48] sm:$0xff]   ;;  %v49_v63 = vsub.s32 0, %v48_v62  ;;  %v53_v1 = vsub.s32 1, %v48_v62 }
  0x12   :  { %403 = vmatpush1.bf16.msra.mxu1 %v752_v22  ;;  %v790_v51 = vld [vmem:[%s1059_s5] sm:$0xff]   ;;  %v792_v53 = vld [vmem:[%s1059_s5 + $0x8] sm:$0xff]   ;;  %v793_v54 = vld [vmem:[%s1059_s5 + $0x50] sm:$0xff]  }
  0x13   :  { %152 = vmatpush1.bf16.msra.mxu0 %v730_v13  ;;  %404 = vmatprep.subr.bf16.mxu1 %v753_v24  ;;  %v794_v55 = vld [vmem:[%s1059_s5 + $0x10] sm:$0xff]   ;;  %v795_v56 = vld [vmem:[%s1059_s5 + $0x58] sm:$0xff]   ;;  %v797_v58 = vld [vmem:[%s1059_s5 + $0x60] sm:$0xff]  }
  0x14   :  { %153 = vmatprep.subr.bf16.mxu0 %v731_v15  ;;  %v796_v57 = vld [vmem:[%s1059_s5 + $0x18] sm:$0xff]   ;;  %v798_v59 = vld [vmem:[%s1059_s5 + $0x20] sm:$0xff]   ;;  %v799_v60 = vld [vmem:[%s1059_s5 + $0x68] sm:$0xff]  }
  0x15   :  { %v45_v0 = vld [vmem:[%s1060_s2] sm:$0x3]  ;;  %v800_v18 = vld [vmem:[%s1059_s5 + $0x28] sm:$0xff]   ;;  %v802_v20 = vld [vmem:[%s1059_s5 + $0x30] sm:$0xff]  }
  0x16   :  { %405 = vmatpush1.bf16.msra.mxu1 %v755_v26  ;;  %v50_v2 = vrot.slane %v45_v0, %v49_v63  ;;  %v54_v3 = vrot.slane %v45_v0, %v53_v1  ;;  %v804_v22 = vld [vmem:[%s1059_s5 + $0x38] sm:$0xff]  }
  0x17   :  { %154 = vmatpush1.bf16.msra.mxu0 %v733_v17  ;;  %406 = vmatprep.subr.bf16.mxu1 %v756_v27 }
  0x18   :  { %155 = vmatprep.subr.bf16.mxu0 %v734_v19  ;;  %v801_v19 = vld [vmem:[%s1059_s5 + $0x70] sm:$0xff]  }
  0x1a   :  { %407 = vmatpush1.bf16.msra.mxu1 %v758_v29 }
  0x1b   :  { %156 = vmatpush1.bf16.msra.mxu0 %v736_v21  ;;  %408 = vmatprep.subr.bf16.mxu1 %v759_v30  ;;  %v803_v21 = vld [vmem:[%s1059_s5 + $0x78] sm:$0xff]  }
  0x1c   :  { %157 = vmatprep.subr.bf16.mxu0 %v737_v23  ;;  %v224_v23 = vld [vmem:[%s1061_s4] sm:$0x3] }
  0x1d   :  { %v229_v24 = vrot.slane %v224_v23, %v49_v63 }
  0x1e   :  { %409 = vmatpush1.bf16.msra.mxu1 %v761_v31 }
  0x1f   :  { %158 = vmatpush1.bf16.msra.mxu0 %v739_v25  ;;  %410 = vmatprep.subr.bf16.mxu1 %v762_v32  ;;  %v233_v25 = vrot.slane %v224_v23, %v53_v1 }
  0x20   :  { %693 = vmatprep.subr.bf16.mxu0 %v789_v50 }
  0x22   :  { %176 = vmatmul.mubr.bf16.vlgmr.msra.gmra.mrb[0].mxu0 %v740_v28  ;;  %411 = vmatpush1.bf16.msra.mxu1 %v764_v33 }
  0x23   :  { %412 = vmatprep.subr.bf16.mxu1 %v765_v34  ;;  %694 = vmatpush3.bf16.msra.mxu0 %v790_v51 }
  0x24   :  { %695 = vmatprep.subr.bf16.mxu0 %v791_v52 }
  0x26   :  { %413 = vmatpush1.bf16.msra.mxu1 %v767_v35 }
  0x27   :  { %414 = vmatprep.subr.bf16.mxu1 %v768_v36  ;;  %696 = vmatpush3.bf16.msra.mxu0 %v792_v53 }
  0x28   :  { %697 = vmatprep.subr.bf16.mxu0 %v793_v54 }
  0x2a   :  { %415 = vmatpush1.bf16.msra.mxu1 %v770_v37 }
  0x2b   :  { %416 = vmatprep.subr.bf16.mxu1 %v771_v38  ;;  %698 = vmatpush3.bf16.msra.mxu0 %v794_v55 }
  0x2c   :  { %699 = vmatprep.subr.bf16.mxu0 %v795_v56 }
  0x2e   :  { %417 = vmatpush1.bf16.msra.mxu1 %v773_v39 }
  0x2f   :  { %418 = vmatprep.subr.bf16.mxu1 %v774_v40  ;;  %700 = vmatpush3.bf16.msra.mxu0 %v796_v57 }
  0x30   :  { %701 = vmatprep.subr.bf16.mxu0 %v797_v58 }
  0x32   :  { %419 = vmatpush1.bf16.msra.mxu1 %v776_v41  ;;  %v676_v41 = vld [vmem:[%s1062_s6] ss:$0 sm:$0xff] }
  0x33   :  { %420 = vmatprep.subr.bf16.mxu1 %v777_v42  ;;  %702 = vmatpush3.bf16.msra.mxu0 %v798_v59 }
  0x34   :  { %703 = vmatprep.subr.bf16.mxu0 %v799_v60 }
  0x36   :  { %421 = vmatpush1.bf16.msra.mxu1 %v779_v43 }
  0x37   :  { %422 = vmatprep.subr.bf16.mxu1 %v780_v44  ;;  %704 = vmatpush3.bf16.msra.mxu0 %v800_v18 }
  0x38   :  { %705 = vmatprep.subr.bf16.mxu0 %v801_v19 }
  0x3a   :  { %423 = vmatpush1.bf16.msra.mxu1 %v782_v45 }
  0x3b   :  { %424 = vmatprep.subr.bf16.mxu1 %v783_v46  ;;  %706 = vmatpush3.bf16.msra.mxu0 %v802_v20 }
  0x3c   :  { %707 = vmatprep.subr.bf16.mxu0 %v803_v21 }
  0x3e   :  { %425 = vmatpush1.bf16.msra.mxu1 %v785_v47 }
  0x3f   :  { %426 = vmatprep.subr.bf16.mxu1 %v786_v48  ;;  %708 = vmatpush3.bf16.msra.mxu0 %v804_v22 }
  0x42   :  { %427 = vmatpush1.bf16.msra.mxu1 %v788_v49 }
  0xf5   :  { %v177_v4 = vpop.f32.mrb[0].mxu0 }
  0xf6   :  { %v178_v5 = vadd.f32 %v177_v4, %v50_v2  ;;  %v179_v6 = vpop.f32.mrb[1].mxu0 }
  0xf7   :  { %v180_v7 = vadd.f32 %v179_v6, %v54_v3  ;;  %v181_v8 = vpop.f32.mrb[2].mxu0 }
  0xf8   :  { %v182_v9 = vadd.f32 %v181_v8, %v50_v2  ;;  %v183_v10 = vpop.f32.mrb[3].mxu0  ;;  %v186_v12 = vmax.f32 %v178_v5, 0.0 }
  0xf9   :  { %v184_v11 = vadd.f32 %v183_v10, %v54_v3  ;;  %v187_v14 = vmax.f32 %v180_v7, 0.0 }
  0xfa   :  { %v188_v13 = vmax.f32 %v182_v9, 0.0 }
  0xfb   :  { %v189_v15 = vmax.f32 %v184_v11, 0.0 }
  0xfc   :  { %v190_v16 = vpack.c.bf16 %v188_v13, %v186_v12 }
  0xfd   :  { %v191_v17 = vpack.c.bf16 %v189_v15, %v187_v14 }
  0xff   :  { %428 = vmatprep.mubr.bf16.mxu1 %v191_v17 }
 0x100   :  { %429 = vmatmul.mubr.bf16.vlgmr.msra.gmra.mrb[0].mxu1 %v190_v16 }
 0x1d3   :  { %v430_v26 = vpop.f32.mrb[0].mxu1 }
 0x1d4   :  { %v431_v27 = vadd.f32 %v430_v26, %v229_v24  ;;  %v432_v28 = vpop.f32.mrb[1].mxu1 }
 0x1d5   :  { %v433_v29 = vadd.f32 %v432_v28, %v233_v25  ;;  %v434_v30 = vpop.f32.mrb[2].mxu1 }
 0x1d6   :  { %v435_v31 = vadd.f32 %v434_v30, %v229_v24  ;;  %v436_v32 = vpop.f32.mrb[3].mxu1  ;;  %v439_v34 = vmax.f32 %v431_v27, 0.0 }
 0x1d7   :  { %v437_v33 = vadd.f32 %v436_v32, %v233_v25  ;;  %v440_v36 = vmax.f32 %v433_v29, 0.0 }
 0x1d8   :  { %v441_v35 = vmax.f32 %v435_v31, 0.0 }
 0x1d9   :  { %v442_v37 = vmax.f32 %v437_v33, 0.0 }
 0x1da   :  { %v443_v38 = vpack.c.bf16 %v441_v35, %v439_v34 }
 0x1db   :  { %v444_v39 = vpack.c.bf16 %v442_v37, %v440_v36 }
 0x1dd   :  { %612 = vmatprep.mubr.bf16.mxu0 %v444_v39 }
 0x1de   :  { %613 = vmatmul.mubr.bf16.vlgmr.msra.gmra.mrb[4].mxu0 %v443_v38 }
 0x2b1   :  { %v709_v40 = vpop.f32.mrb[4].mxu0 }
 0x2b2   :  { %v710_v42 = vpop.f32.mrb[5].mxu0 }
 0x2b3   :  { %v711_v43 = vadd.f32 %v710_v42, %v709_v40  ;;  %v712_v44 = vpop.f32.mrb[6].mxu0 }
 0x2b4   :  { %v713_v45 = vpop.f32.mrb[7].mxu0 }
 0x2b5   :  { %v615_v46 = vadd.f32 %v711_v43, %v676_v41  ;;  %v714_v47 = vadd.f32 %v713_v45, %v712_v44 }
 0x2b7   :  { %621 = vst [vmem:[%s1063_s7] sm:$0xff] %v615_v46  ;;  %v618_v48 = vadd.f32 %v714_v47, %v676_v41 }
 0x2b9   :  { %622 = vst [vmem:[%s1063_s7 + $0x8] sm:$0xff] %v618_v48 }

</bundles_post_ra>
